<compile_context>
chip_gen: v7x
topology: tpu7x:2x2x1
jax: 0.10.0
libtpu: 0.0.40
codegen_flags: <defaults>
</compile_context>

<pallas_src>
import jax
import jax.numpy as jnp
from jax.experimental import pallas as pl
from jax.experimental.pallas import tpu as pltpu


def _round_up(v, m):
    return ((v + m - 1) // m) * m


def _predictor_kernel(x_ref, w_ref, b_ref, out_ref):
    # x: (TN, Cp), w: (Cp, OUTp), b: (1, OUTp)  -> out: (TN, OUTp)
    acc = jnp.dot(x_ref[...], w_ref[...], preferred_element_type=jnp.float32)
    out_ref[...] = (acc + b_ref[...]).astype(out_ref.dtype)


def fast_rcnn_predictor(x, w_cls, b_cls, w_bbox, b_bbox, *,
                        compute_dtype=None, tile_n=256):
    """Forward pass of FastRCNNPredictor.

    x:       (N, C) or (N, C, 1, 1)
    w_cls:   (num_classes, C)      (PyTorch nn.Linear layout)
    b_cls:   (num_classes,)
    w_bbox:  (4*num_classes, C)
    b_bbox:  (4*num_classes,)
    Returns (scores, bbox_deltas): (N, num_classes), (N, 4*num_classes).
    """
    if x.ndim == 4:
        assert x.shape[2] == 1 and x.shape[3] == 1, "expected [*, *, 1, 1] input"
    x2 = x.reshape(x.shape[0], -1)                       # flatten(start_dim=1)
    n, c = x2.shape
    num_classes = w_cls.shape[0]
    num_bbox = w_bbox.shape[0]
    out_dim = num_classes + num_bbox
    out_dtype = x2.dtype

    # Fuse the two heads: (C, num_classes + 4*num_classes) weight, fused bias.
    w_fused = jnp.concatenate([w_cls.T, w_bbox.T], axis=1)           # (C, OUT)
    b_fused = jnp.concatenate([b_cls, b_bbox], axis=0).reshape(1, out_dim)

    # Pad contraction and output dims to lane multiples (zeros preserve result).
    c_pad = _round_up(c, 128)
    out_pad = _round_up(out_dim, 128)

    # Batch tiling: one lane-dense tile per grid step; weights stay resident.
    if n <= tile_n:
        tn = max(_round_up(n, 8), 8)
        n_pad = tn
    else:
        tn = tile_n
        n_pad = _round_up(n, tn)
    grid = (n_pad // tn,)

    x_p = jnp.pad(x2, ((0, n_pad - n), (0, c_pad - c)))
    w_p = jnp.pad(w_fused, ((0, c_pad - c), (0, out_pad - out_dim)))
    b_p = jnp.pad(b_fused, ((0, 0), (0, out_pad - out_dim))).astype(jnp.float32)

    if compute_dtype is not None:
        x_p = x_p.astype(compute_dtype)
        w_p = w_p.astype(compute_dtype)

    fused = pl.pallas_call(
        _predictor_kernel,
        out_shape=jax.ShapeDtypeStruct((n_pad, out_pad), out_dtype),
        grid_spec=pl.GridSpec(
            grid=grid,
            in_specs=[
                pl.BlockSpec((tn, c_pad), lambda i: (i, 0)),        # x tile
                pl.BlockSpec((c_pad, out_pad), lambda i: (0, 0)),   # fused W (resident)
                pl.BlockSpec((1, out_pad), lambda i: (0, 0)),       # fused bias (resident)
            ],
            out_specs=pl.BlockSpec((tn, out_pad), lambda i: (i, 0)),
        ),
        compiler_params=pltpu.CompilerParams(
            dimension_semantics=("parallel",)),
    )(x_p, w_p, b_p)

    scores = fused[:n, :num_classes]
    bbox_deltas = fused[:n, num_classes:out_dim]
    return scores, bbox_deltas


if __name__ == "__main__":
    key = jax.random.PRNGKey(0)
    keys = jax.random.split(key, 11)

    # ---- Test 1: small pooled-feature layout (N, C, 1, 1), strict f32 check ----
    batch, in_channels, num_classes = 8, 32, 8
    x = jax.random.normal(keys[0], (batch, in_channels, 1, 1), jnp.float32)
    w_cls = jax.random.normal(keys[1], (num_classes, in_channels), jnp.float32) * 0.05
    b_cls = jax.random.normal(keys[2], (num_classes,), jnp.float32) * 0.05
    w_bbox = jax.random.normal(keys[3], (num_classes * 4, in_channels), jnp.float32) * 0.05
    b_bbox = jax.random.normal(keys[4], (num_classes * 4,), jnp.float32) * 0.05

    scores, bbox_deltas = fast_rcnn_predictor(x, w_cls, b_cls, w_bbox, b_bbox)
    jax.block_until_ready((scores, bbox_deltas))

    x_flat = x.reshape(batch, -1)
    ref_scores = x_flat @ w_cls.T + b_cls
    ref_bbox = x_flat @ w_bbox.T + b_bbox
    assert scores.shape == (batch, num_classes)
    assert bbox_deltas.shape == (batch, num_classes * 4)
    assert jnp.allclose(scores, ref_scores, atol=1e-5)
    assert jnp.allclose(bbox_deltas, ref_bbox, atol=1e-5)

    # ---- Test 2: exercises N tiling (grid>1), C/output padding, bf16 inputs ----
    n2, c2, ncls2 = 384, 160, 11
    x2 = jax.random.normal(keys[5], (n2, c2), jnp.float32)
    w_cls2 = jax.random.normal(keys[6], (ncls2, c2), jnp.float32) * 0.05
    b_cls2 = jax.random.normal(keys[7], (ncls2,), jnp.float32) * 0.05
    w_bbox2 = jax.random.normal(keys[8], (ncls2 * 4, c2), jnp.float32) * 0.05
    b_bbox2 = jax.random.normal(keys[9], (ncls2 * 4,), jnp.float32) * 0.05

    s2, bb2 = fast_rcnn_predictor(x2, w_cls2, b_cls2, w_bbox2, b_bbox2,
                                  compute_dtype=jnp.bfloat16, tile_n=256)
    jax.block_until_ready((s2, bb2))

    ref_s2 = x2 @ w_cls2.T + b_cls2
    ref_bb2 = x2 @ w_bbox2.T + b_bbox2
    assert s2.shape == (n2, ncls2)
    assert bb2.shape == (n2, ncls2 * 4)
    assert jnp.allclose(s2, ref_s2, atol=5e-2, rtol=5e-2)
    assert jnp.allclose(bb2, ref_bb2, atol=5e-2, rtol=5e-2)

    print("KERNEL_OK")
</pallas_src>

<mosaic_0001>
module attributes {stable_mosaic.version = 11 : i64} {
  func.func @_predictor_kernel(%arg0: i32, %arg1: memref<8x128xf32, #tpu.memory_space<vmem>>, %arg2: memref<128x128xf32, #tpu.memory_space<vmem>>, %arg3: memref<1x128xf32, #tpu.memory_space<vmem>>, %arg4: memref<8x128xf32, #tpu.memory_space<vmem>>) attributes {dimension_semantics = [#tpu.dimension_semantics<parallel>], iteration_bounds = array<i64: 1>, scalar_prefetch = 0 : i64, scratch_operands = 0 : i64, tpu.core_type = #tpu.core_type<tc>, window_params = [{transform_indices = @transform_0, window_bounds = array<i64: 8, 128>}, {pipeline_mode = #tpu.pipeline_mode<synchronous>, transform_indices = @transform_1, window_bounds = array<i64: 128, 128>}, {pipeline_mode = #tpu.pipeline_mode<synchronous>, transform_indices = @transform_2, window_bounds = array<i64: 1, 128>}, {transform_indices = @transform_3, window_bounds = array<i64: 8, 128>}]} {
    %c0 = arith.constant 0 : index
    %c0_0 = arith.constant 0 : index
    %0 = vector.load %arg1[%c0, %c0_0] : memref<8x128xf32, #tpu.memory_space<vmem>>, vector<8x128xf32>
    %c0_1 = arith.constant 0 : index
    %c0_2 = arith.constant 0 : index
    %1 = vector.load %arg2[%c0_1, %c0_2] : memref<128x128xf32, #tpu.memory_space<vmem>>, vector<128x128xf32>
    %cst = arith.constant dense<0.000000e+00> : vector<8x128xf32>
    %2 = tpu.matmul %0, %1, %cst {dimension_numbers = #tpu.dot_dimension_numbers<[1], [0], [0], [1], [0, 0, 1, 1], [], []>} : vector<8x128xf32>, vector<128x128xf32>, vector<8x128xf32> -> vector<8x128xf32>
    %c0_3 = arith.constant 0 : index
    %c0_4 = arith.constant 0 : index
    %3 = vector.load %arg3[%c0_3, %c0_4] : memref<1x128xf32, #tpu.memory_space<vmem>>, vector<1x128xf32>
    %4 = vector.broadcast %3 : vector<1x128xf32> to vector<8x128xf32>
    %5 = arith.addf %2, %4 : vector<8x128xf32>
    %c0_5 = arith.constant 0 : index
    %c0_6 = arith.constant 0 : index
    %6 = vector.load %arg4[%c0_5, %c0_6] : memref<8x128xf32, #tpu.memory_space<vmem>>, vector<8x128xf32>
    tpu.vector_store %arg4[%c0_5, %c0_6], %5 {strides = array<i32>} : memref<8x128xf32, #tpu.memory_space<vmem>>, vector<8x128xf32>,
    return
  }
  func.func @transform_0(%arg0: i32) -> (i32, i32) {
    %c0_i32 = arith.constant 0 : i32
    %c0_i32_0 = arith.constant 0 : i32
    return %arg0, %c0_i32 : i32, i32
  }
  func.func @transform_1(%arg0: i32) -> (i32, i32) {
    %c0_i32 = arith.constant 0 : i32
    %c0_i32_0 = arith.constant 0 : i32
    %c0_i32_1 = arith.constant 0 : i32
    return %c0_i32, %c0_i32_0 : i32, i32
  }
  func.func @transform_2(%arg0: i32) -> (i32, i32) {
    %c0_i32 = arith.constant 0 : i32
    %c0_i32_0 = arith.constant 0 : i32
    %c0_i32_1 = arith.constant 0 : i32
    return %c0_i32, %c0_i32_0 : i32, i32
  }
  func.func @transform_3(%arg0: i32) -> (i32, i32) {
    %c0_i32 = arith.constant 0 : i32
    %c0_i32_0 = arith.constant 0 : i32
    return %arg0, %c0_i32 : i32, i32
  }
}

</mosaic_0001>

<bundles_post_ra>
// kernel: tpu_custom_call.1
= control target key start
LH: loop header
LB: loop body
LE: loop exit
PB: predicated region body
PF: predicated region fallthrough
CT: control target
= control target key end

     0   :  { %8 = vsyncpa [#allocation3], 0  ;;  %s383_s0 = inlined_call_operand.hbm [shape: f32[8,128], index: 0, kind: input, shape index: {}]   ;;  %s384_s1 = inlined_call_operand.hbm [shape: f32[128,128], index: 1, kind: input, shape index: {}]   ;;  %s385_s2 = inlined_call_operand.vmem [shape: f32[1,128], index: 2, kind: input, shape index: {}]   ;;  %s386_s3 = inlined_call_operand.hbm [shape: f32[8,128], index: 3, kind: output, shape index: {}]  }
   0x1   :  { %9 = vsyncpa [#allocation6], 0 }
   0x2   :  { %10 = vsyncpa [#allocation4], 0  ;;  %s309_s12 = smov [#allocation2]   ;;  %s310_s14 = smov [#allocation5]  }
   0x3   :  { %s17_s13 = sshll.u32 %s309_s12, 4  ;;  %s26_s15 = sshll.u32 %s310_s14, 4  ;;  %s18_s13 = int_to_ptr.vmem [resolvable:$true] %s17_s13  ;;  %s337_s15 = int_to_ptr.vmem [resolvable:$true] %s26_s15 }
   0x4   :  { %s237_s18 = scalar_lea.hbm %s383_s0, 128 }
   0x5   :  { %p238_p0 = scmp.ne.s32.totalorder %s383_s0, %s237_s18  ;;  %p241_p1 = scmp.lt.u32.totalorder %s237_s18, %s383_s0 }
   0x7   :  { %p243_p2 = pnand %p241_p1, %p238_p0 }
   0x9   :  { %246 = shalt.err (!%p243_p2)
}
   0xa   :  { %s247_s23 = scalar_lea.vmem %s18_s13, 128  ;;  %p252_p4 = scmp.lt.s32.totalorder %s18_s13, %s18_s13 }
   0xb   :  { %p248_p3 = scmp.ne.s32.totalorder %s18_s13, %s247_s23  ;;  %p253_p5 = scmp.lt.s32.totalorder %s247_s23, %s247_s23 }
   0xd   :  { %p254_p6 = por %p253_p5, %p252_p4 }
   0xf   :  { %p255_p7 = pnand %p254_p6, %p248_p3 }
  0x11   :  { %258 = shalt.err (!%p255_p7)
}
  0x12   :  { %20 = dma.hbm_to_vmem [thread:$0]  %s383_s0, 128, %s18_s13, [#allocation3]  }
  0x13   :  { %s259_s28 = scalar_lea.hbm %s384_s1, 2048 }
  0x14   :  { %p260_p8 = scmp.ne.s32.totalorder %s384_s1, %s259_s28  ;;  %p263_p9 = scmp.lt.u32.totalorder %s259_s28, %s384_s1 }
  0x16   :  { %p265_p10 = pnand %p263_p9, %p260_p8 }
  0x18   :  { %268 = shalt.err (!%p265_p10)
}
  0x19   :  { %s269_s6 = scalar_lea.vmem %s337_s15, 2048  ;;  %p274_p12 = scmp.lt.s32.totalorder %s337_s15, %s337_s15 }
  0x1a   :  { %p270_p11 = scmp.ne.s32.totalorder %s337_s15, %s269_s6  ;;  %p275_p13 = scmp.lt.s32.totalorder %s269_s6, %s269_s6 }
  0x1c   :  { %p276_p0 = por %p275_p13, %p274_p12 }
  0x1e   :  { %p277_p1 = pnand %p276_p0, %p270_p11 }
  0x20   :  { %280 = shalt.err (!%p277_p1)
}
  0x21   :  { %s311_s0 = smov 128   ;;  %s312_s7 = smov 8  }
  0x22   :  { %32 = dma.hbm_to_vmem [thread:$0]  %s384_s1, 2048, %s337_s15, [#allocation6], %s311_s0, %s311_s0, %s312_s7  }
  0x23   :  { %303 = dma.done.wait [#allocation3], 128  }
  0x24   :  { %304 = vsyncadd [#allocation3], 4294967168 }
  0x25   :  { %305 = dma.done.wait [#allocation6], 2048  }
  0x26   :  { %306 = vsyncadd [#allocation6], 4294965248  ;;  %v313_v0 = vmov 0.0|0.0   ;;  %vm314_vm0 = vmmov 0   ;;  %v315_v1 = vmov 0.0   ;;  %v42_v2 = vld [vmem:[#allocation5] sm:$0xff] }
  0x27   :  { %205 = vmatprep.subr.bf16.mxu0 %v313_v0  ;;  %202 = vmatprep.mubr.msk.f32.mxu0 %vm314_vm0, %v315_v1  ;;  %v43_v3 = vld [vmem:[#allocation5 + $0x8] sm:$0xff]  ;;  %v44_v4 = vld [vmem:[#allocation5 + $0x10] sm:$0xff]  ;;  %v45_v6 = vld [vmem:[#allocation5 + $0x18] sm:$0xff]  ;;  %s316_s11 = smov [#allocation7]  }
  0x28   :  { %v206_v5 = vpack.c.bf16 %v43_v3, %v42_v2  ;;  %v209_v7 = vpack.c.bf16 %v45_v6, %v44_v4  ;;  %v46_v8 = vld [vmem:[#allocation5 + $0x20] sm:$0xff]  ;;  %v47_v9 = vld [vmem:[#allocation5 + $0x28] sm:$0xff]  ;;  %v48_v11 = vld [vmem:[#allocation5 + $0x30] sm:$0xff]  ;;  %s142_s12 = sshll.u32 %s316_s11, 4  ;;  %s143_s12 = int_to_ptr.vmem [resolvable:$true] %s142_s12 }
  0x29   :  { %v212_v10 = vpack.c.bf16 %v47_v9, %v46_v8  ;;  %v49_v12 = vld [vmem:[#allocation5 + $0x38] sm:$0xff]  ;;  %v50_v14 = vld [vmem:[#allocation5 + $0x40] sm:$0xff]  ;;  %v51_v15 = vld [vmem:[#allocation5 + $0x48] sm:$0xff]  ;;  %s281_s13 = scalar_lea.vmem %s143_s12, 128  ;;  %p286_p3 = scmp.lt.s32.totalorder %s143_s12, %s143_s12 }
  0x2a   :  { %207 = vmatpush3.bf16.msra.mxu0 %v206_v5  ;;  %v215_v13 = vpack.c.bf16 %v49_v12, %v48_v11  ;;  %v218_v16 = vpack.c.bf16 %v51_v15, %v50_v14  ;;  %v52_v17 = vld [vmem:[#allocation5 + $0x50] sm:$0xff]  ;;  %v53_v18 = vld [vmem:[#allocation5 + $0x58] sm:$0xff]  ;;  %v54_v20 = vld [vmem:[#allocation5 + $0x60] sm:$0xff]  ;;  %p282_p2 = scmp.ne.s32.totalorder %s143_s12, %s281_s13  ;;  %p287_p4 = scmp.lt.s32.totalorder %s281_s13, %s281_s13 }
  0x2b   :  { %208 = vmatprep.subr.bf16.mxu0 %v313_v0  ;;  %v221_v19 = vpack.c.bf16 %v53_v18, %v52_v17  ;;  %v55_v21 = vld [vmem:[#allocation5 + $0x68] sm:$0xff]  ;;  %v56_v23 = vld [vmem:[#allocation5 + $0x70] sm:$0xff]  ;;  %v57_v24 = vld [vmem:[#allocation5 + $0x78] sm:$0xff] }
  0x2c   :  { %v224_v22 = vpack.c.bf16 %v55_v21, %v54_v20  ;;  %v227_v25 = vpack.c.bf16 %v57_v24, %v56_v23  ;;  %v41_v26 = vld [vmem:[#allocation2] sm:$0xff]  ;;  %p288_p5 = por %p287_p4, %p286_p3 }
  0x2d   :  { %v152_v27 = vld [vmem:[%s385_s2] ss:$0 sm:$0xff] }
  0x2e   :  { %210 = vmatpush3.bf16.msra.mxu0 %v209_v7  ;;  %p289_p6 = pnand %p288_p5, %p282_p2 }
  0x2f   :  { %211 = vmatprep.subr.bf16.mxu0 %v313_v0 }
  0x32   :  { %213 = vmatpush3.bf16.msra.mxu0 %v212_v10 }
  0x33   :  { %214 = vmatprep.subr.bf16.mxu0 %v313_v0 }
  0x36   :  { %216 = vmatpush3.bf16.msra.mxu0 %v215_v13 }
  0x37   :  { %217 = vmatprep.subr.bf16.mxu0 %v313_v0 }
  0x3a   :  { %219 = vmatpush3.bf16.msra.mxu0 %v218_v16 }
  0x3b   :  { %220 = vmatprep.subr.bf16.mxu0 %v313_v0 }
  0x3e   :  { %222 = vmatpush3.bf16.msra.mxu0 %v221_v19 }
  0x3f   :  { %223 = vmatprep.subr.bf16.mxu0 %v313_v0 }
  0x42   :  { %225 = vmatpush3.bf16.msra.mxu0 %v224_v22 }
  0x43   :  { %226 = vmatprep.subr.bf16.mxu0 %v313_v0 }
  0x46   :  { %228 = vmatpush3.bf16.msra.mxu0 %v227_v25 }
  0x49   :  { %203 = vmatmul.mubr.f32.vlgmr.msra.gmra.mrb[0].mxu0 %v41_v26 }
 0x11c   :  { %v131_v28 = vpop.f32.mrb[0].mxu0 }
 0x11d   :  { %v132_v29 = vadd.f32 %v152_v27, %v131_v28  ;;  %v204_v30 = vpop.f32.mrb[1].mxu0 }
 0x11f   :  { %135 = vst [vmem:[#allocation7] sm:$0xff] %v132_v29 }
 0x120   :  { %292 = shalt.err (!%p289_p6)
}
 0x121   :  { %s293_s16 = scalar_lea.hbm %s386_s3, 128 }
 0x122   :  { %p294_p7 = scmp.ne.s32.totalorder %s386_s3, %s293_s16  ;;  %p297_p8 = scmp.lt.u32.totalorder %s293_s16, %s386_s3 }
 0x124   :  { %p299_p9 = pnand %p297_p8, %p294_p7 }
 0x126   :  { %302 = shalt.err (!%p299_p9)
}
 0x127   :  { %145 = dma.vmem_to_hbm [thread:$0]  %s143_s12, 128, %s386_s3, [#allocation4]  }
 0x128   :  { %307 = dma.done.wait [#allocation4], 128  }
 0x129   :  { %308 = vsyncadd [#allocation4], 4294967168 }
 0x12a   :  { %149 = vsyncpa [#allocation3], 1 }
 0x12b   :  { %150 = vsyncpa [#allocation6], 1 }
 0x12c   :  { %151 = vsyncpa [#allocation4], 1 }

</bundles_post_ra>
